<compile_context>
chip_gen: v5e
topology: v5e:2x2
jax: 0.10.0
libtpu: 0.0.40
codegen_flags: <defaults>
</compile_context>

<pallas_src>
import jax
import jax.numpy as jnp
from jax.experimental import pallas as pl
from jax.experimental.pallas import tpu as pltpu


def jlinear_kernel(g_ref, w_ref, out_ref):
    # W = J_^T - J_ is precomputed in the wrapper, so per tile this is just
    # one MXU matmul: out = grad_H @ W (accumulated in f32).
    out_ref[...] = jnp.dot(
        g_ref[...], w_ref[...], preferred_element_type=jnp.float32
    ).astype(out_ref.dtype)


def _pick_block_b(B, dim, itemsize, vmem_budget_bytes):
    """Pick a batch tile: one block for small B, large even-grid tiles otherwise."""
    # Streamed VMEM per row: grad_H tile + out tile, double-buffered each.
    per_row = 2 * 2 * dim * itemsize
    weight_bytes = dim * dim * itemsize  # single-buffered resident weight
    max_rows = max(8, (vmem_budget_bytes - weight_bytes) // per_row)

    # Small B: one block, no pipeline prologue/epilogue overhead.
    if B <= min(1024, max_rows):
        return B

    # Large B: aim for 512-2048-row tiles and an even grid (2 TCs on v7x).
    for cand in (2048, 1024, 512, 256, 128, 64, 32, 16, 8):
        if cand <= max_rows and B % cand == 0 and (B // cand) % 2 == 0:
            return cand
    for cand in (2048, 1024, 512, 256, 128, 64, 32, 16, 8):
        if cand <= max_rows and B % cand == 0:
            return cand
    return 8  # correct via masked partial last block, even if B % 8 != 0


def jlinear_forward(x, grad_H, J_, *, block_b=None, use_bf16=False,
                    vmem_budget_bytes=48 * 1024 * 1024):
    # `x` is accepted for signature parity with the PyTorch module but is unused
    # by forward() (it only matters for reparam()).
    del x
    B, dim = grad_H.shape
    assert J_.shape == (dim, dim)

    # Hoist the skew-symmetrization out of the kernel: done once here instead of
    # once per grid step on the constant weight tile.
    # F.linear(grad_H, J) = grad_H @ J^T = grad_H @ (J_^T - J_).
    W = (J_.T - J_).astype(jnp.float32)  # subtract in f32 (v5e VPU has no bf16)

    g = grad_H
    if use_bf16:
        g = g.astype(jnp.bfloat16)
        W = W.astype(jnp.bfloat16)

    itemsize = jnp.dtype(g.dtype).itemsize
    if block_b is None:
        block_b = _pick_block_b(B, dim, itemsize, vmem_budget_bytes)
    grid = (pl.cdiv(B, block_b),)

    cost = pl.CostEstimate(
        flops=2 * B * dim * dim,
        transcendentals=0,
        bytes_accessed=itemsize * (B * dim + dim * dim) + 4 * B * dim,
    )

    # Constant weight: block index never changes, so single-buffer it to free
    # VMEM (critical under v7x's 64 MiB).
    try:
        w_spec = pl.BlockSpec((dim, dim), lambda i: (0, 0),
                              pipeline_mode=pl.Buffered(1))
    except TypeError:  # older jax without pipeline_mode on BlockSpec
        w_spec = pl.BlockSpec((dim, dim), lambda i: (0, 0))

    return pl.pallas_call(
        jlinear_kernel,
        out_shape=jax.ShapeDtypeStruct((B, dim), jnp.float32),
        grid=grid,
        in_specs=[
            pl.BlockSpec((block_b, dim), lambda i: (i, 0)),  # grad_H: batch-tiled
            w_spec,                                          # W: grid-resident weight
        ],
        out_specs=pl.BlockSpec((block_b, dim), lambda i: (i, 0)),
        compiler_params=pltpu.CompilerParams(
            dimension_semantics=("parallel",),               # megacore / 2 TCs on v7x
            vmem_limit_bytes=64 * 1024 * 1024,
        ),
        cost_estimate=cost,
    )(g, W)


# ---------------- pure-JAX reference for verification ----------------
def forward_ref(grad_H, J_):
    J = J_ - J_.T
    return grad_H @ J.T


if __name__ == "__main__":
    B, dim = 64, 128  # small, lane-dense (dim = 128); runs as a single (64,128) block

    key = jax.random.PRNGKey(0)
    kx, kg, kj = jax.random.split(key, 3)
    x = jax.random.normal(kx, (B, dim), jnp.float32)  # unused by forward()
    grad_H = jax.random.normal(kg, (B, dim), jnp.float32)
    # mimic nn.init.kaiming_normal_ (fan_in = dim, gain = sqrt(2))
    J_ = jax.random.normal(kj, (dim, dim), jnp.float32) * (2.0 / dim) ** 0.5

    out = jlinear_forward(x, grad_H, J_)
    jax.block_until_ready(out)

    ref = forward_ref(grad_H, J_)
    assert out.shape == (B, dim)
    assert jnp.allclose(out, ref, atol=1e-3, rtol=1e-3), float(
        jnp.max(jnp.abs(out - ref))
    )

    print("KERNEL_OK")
</pallas_src>

<mosaic_0001>
module attributes {stable_mosaic.version = 11 : i64} {
  func.func @jlinear_kernel(%arg0: i32, %arg1: memref<64x128xf32, #tpu.memory_space<vmem>>, %arg2: memref<128x128xf32, #tpu.memory_space<vmem>>, %arg3: memref<64x128xf32, #tpu.memory_space<vmem>>) attributes {dimension_semantics = [#tpu.dimension_semantics<parallel>], iteration_bounds = array<i64: 1>, scalar_prefetch = 0 : i64, scratch_operands = 0 : i64, tpu.core_type = #tpu.core_type<tc>, window_params = [{transform_indices = @transform_0, window_bounds = array<i64: 64, 128>}, {pipeline_mode = #tpu.pipeline_mode<synchronous>, transform_indices = @transform_1, window_bounds = array<i64: 128, 128>}, {transform_indices = @transform_2, window_bounds = array<i64: 64, 128>}]} {
    %c0 = arith.constant 0 : index
    %c0_0 = arith.constant 0 : index
    %0 = vector.load %arg1[%c0, %c0_0] : memref<64x128xf32, #tpu.memory_space<vmem>>, vector<64x128xf32>
    %c0_1 = arith.constant 0 : index
    %c0_2 = arith.constant 0 : index
    %1 = vector.load %arg2[%c0_1, %c0_2] : memref<128x128xf32, #tpu.memory_space<vmem>>, vector<128x128xf32>
    %cst = arith.constant dense<0.000000e+00> : vector<64x128xf32>
    %2 = tpu.matmul %0, %1, %cst {dimension_numbers = #tpu.dot_dimension_numbers<[1], [0], [0], [1], [0, 0, 1, 1], [], []>} : vector<64x128xf32>, vector<128x128xf32>, vector<64x128xf32> -> vector<64x128xf32>
    %c0_3 = arith.constant 0 : index
    %c0_4 = arith.constant 0 : index
    %3 = vector.load %arg3[%c0_3, %c0_4] : memref<64x128xf32, #tpu.memory_space<vmem>>, vector<64x128xf32>
    tpu.vector_store %arg3[%c0_3, %c0_4], %2 {strides = array<i32>} : memref<64x128xf32, #tpu.memory_space<vmem>>, vector<64x128xf32>,
    return
  }
  func.func @transform_0(%arg0: i32) -> (i32, i32) {
    %c0_i32 = arith.constant 0 : i32
    %c0_i32_0 = arith.constant 0 : i32
    return %arg0, %c0_i32 : i32, i32
  }
  func.func @transform_1(%arg0: i32) -> (i32, i32) {
    %c0_i32 = arith.constant 0 : i32
    %c0_i32_0 = arith.constant 0 : i32
    %c0_i32_1 = arith.constant 0 : i32
    return %c0_i32, %c0_i32_0 : i32, i32
  }
  func.func @transform_2(%arg0: i32) -> (i32, i32) {
    %c0_i32 = arith.constant 0 : i32
    %c0_i32_0 = arith.constant 0 : i32
    return %arg0, %c0_i32 : i32, i32
  }
}

</mosaic_0001>

<bundles_post_ra>
// kernel: tpu_custom_call.1
= control target key start
LH: loop header
LB: loop body
LE: loop exit
PB: predicated region body
PF: predicated region fallthrough
CT: control target
= control target key end

     0   :  { %7 = vsyncpa [#allocation3], 0  ;;  %s306_s0 = inlined_call_operand.hbm [shape: f32[64,128], index: 0, kind: input, shape index: {}]   ;;  %s307_s1 = inlined_call_operand.hbm [shape: f32[128,128], index: 1, kind: input, shape index: {}]   ;;  %s308_s2 = inlined_call_operand.hbm [shape: f32[64,128], index: 2, kind: output, shape index: {}]  }
   0x1   :  { %8 = vsyncpa [#allocation6], 0 }
   0x2   :  { %9 = vsyncpa [#allocation4], 0  ;;  %s14_s11 = sshll.u32 %s306_s0, 4  ;;  %s268_s12 = smov [#allocation2]   ;;  %s15_s11 = int_to_ptr.hbm [resolvable:$true] %s14_s11 }
   0x3   :  { %s16_s13 = sshll.u32 %s268_s12, 4  ;;  %s27_s16 = sshll.u32 %s307_s1, 4  ;;  %s17_s13 = int_to_ptr.vmem [resolvable:$true] %s16_s13  ;;  %s28_s16 = int_to_ptr.hbm [resolvable:$true] %s27_s16 }
   0x4   :  { %s269_s17 = smov 128   ;;  %s270_s18 = smov 8  }
   0x5   :  { %22 = dma.hbm_to_vmem [thread:$0]  %s15_s11, 1024, %s17_s13, [#allocation3], %s269_s17, %s269_s17, %s270_s18  }
   0x6   :  { %s271_s19 = smov [#allocation5]  }
   0x7   :  { %s29_s20 = sshll.u32 %s271_s19, 4  ;;  %s30_s20 = int_to_ptr.vmem [resolvable:$true] %s29_s20 }
   0x8   :  { %35 = dma.hbm_to_vmem [thread:$0]  %s28_s16, 2048, %s30_s20, [#allocation6], %s269_s17, %s269_s17, %s270_s18  }
   0x9   :  { %262 = dma.done.wait [#allocation3], 1024  }
   0xa   :  { %263 = vsyncadd [#allocation3], 4294966272 }
   0xb   :  { %264 = dma.done.wait [#allocation6], 2048  }
   0xc   :  { %265 = vsyncadd [#allocation6], 4294965248  ;;  %v67_v0 = vld [vmem:[#allocation5 + $0x78] sm:$0xff]  ;;  %v66_v1 = vld [vmem:[#allocation5 + $0x70] sm:$0xff]  ;;  %s272_s0 = smov [#allocation7]   ;;  %s123_s23 = sshll.u32 %s308_s2, 4  ;;  %s124_s23 = int_to_ptr.hbm [resolvable:$true] %s123_s23 }
   0xd   :  { %138 = vmatpush.msra.mxu2 %v67_v0  ;;  %139 = vmatpush.msra.mxu3 %v67_v0  ;;  %v65_v2 = vld [vmem:[#allocation5 + $0x68] sm:$0xff]  ;;  %v64_v3 = vld [vmem:[#allocation5 + $0x60] sm:$0xff]  ;;  %v63_v4 = vld [vmem:[#allocation5 + $0x58] sm:$0xff]  ;;  %s121_s1 = sshll.u32 %s272_s0, 4  ;;  %s122_s1 = int_to_ptr.vmem [resolvable:$true] %s121_s1 }
   0xe   :  { %68 = vmatpush.msra.mxu0 %v67_v0  ;;  %137 = vmatpush.msra.mxu1 %v67_v0  ;;  %v62_v5 = vld [vmem:[#allocation5 + $0x50] sm:$0xff]  ;;  %v61_v6 = vld [vmem:[#allocation5 + $0x48] sm:$0xff]  ;;  %v60_v7 = vld [vmem:[#allocation5 + $0x40] sm:$0xff] }
   0xf   :  { %141 = vmatpush.msra.mxu2 %v66_v1  ;;  %142 = vmatpush.msra.mxu3 %v66_v1  ;;  %v59_v8 = vld [vmem:[#allocation5 + $0x38] sm:$0xff]  ;;  %v58_v9 = vld [vmem:[#allocation5 + $0x30] sm:$0xff]  ;;  %v57_v10 = vld [vmem:[#allocation5 + $0x28] sm:$0xff] }
  0x10   :  { %69 = vmatpush.msra.mxu0 %v66_v1  ;;  %140 = vmatpush.msra.mxu1 %v66_v1  ;;  %v56_v11 = vld [vmem:[#allocation5 + $0x20] sm:$0xff]  ;;  %v55_v12 = vld [vmem:[#allocation5 + $0x18] sm:$0xff]  ;;  %v54_v13 = vld [vmem:[#allocation5 + $0x10] sm:$0xff] }
  0x11   :  { %144 = vmatpush.msra.mxu2 %v65_v2  ;;  %145 = vmatpush.msra.mxu3 %v65_v2  ;;  %v53_v14 = vld [vmem:[#allocation5 + $0x8] sm:$0xff]  ;;  %v52_v15 = vld [vmem:[#allocation5] sm:$0xff]  ;;  %v50_v17 = vld [vmem:[#allocation2 + $0x30] sm:$0xff] }
  0x12   :  { %70 = vmatpush.msra.mxu0 %v65_v2  ;;  %143 = vmatpush.msra.mxu1 %v65_v2  ;;  %v48_v16 = vld [vmem:[#allocation2 + $0x20] sm:$0xff]  ;;  %v46_v19 = vld [vmem:[#allocation2 + $0x10] sm:$0xff]  ;;  %v49_v20 = vld [vmem:[#allocation2 + $0x28] sm:$0xff] }
  0x13   :  { %147 = vmatpush.msra.mxu2 %v64_v3  ;;  %148 = vmatpush.msra.mxu3 %v64_v3  ;;  %v44_v18 = vld [vmem:[#allocation2] sm:$0xff]  ;;  %v51_v21 = vld [vmem:[#allocation2 + $0x38] sm:$0xff]  ;;  %v45_v22 = vld [vmem:[#allocation2 + $0x8] sm:$0xff] }
  0x14   :  { %71 = vmatpush.msra.mxu0 %v64_v3  ;;  %146 = vmatpush.msra.mxu1 %v64_v3  ;;  %v47_v23 = vld [vmem:[#allocation2 + $0x18] sm:$0xff] }
  0x15   :  { %150 = vmatpush.msra.mxu2 %v63_v4  ;;  %151 = vmatpush.msra.mxu3 %v63_v4 }
  0x16   :  { %72 = vmatpush.msra.mxu0 %v63_v4  ;;  %149 = vmatpush.msra.mxu1 %v63_v4 }
  0x17   :  { %153 = vmatpush.msra.mxu2 %v62_v5  ;;  %154 = vmatpush.msra.mxu3 %v62_v5 }
  0x18   :  { %73 = vmatpush.msra.mxu0 %v62_v5  ;;  %152 = vmatpush.msra.mxu1 %v62_v5 }
  0x19   :  { %156 = vmatpush.msra.mxu2 %v61_v6  ;;  %157 = vmatpush.msra.mxu3 %v61_v6 }
  0x1a   :  { %74 = vmatpush.msra.mxu0 %v61_v6  ;;  %155 = vmatpush.msra.mxu1 %v61_v6 }
  0x1b   :  { %159 = vmatpush.msra.mxu2 %v60_v7  ;;  %160 = vmatpush.msra.mxu3 %v60_v7 }
  0x1c   :  { %75 = vmatpush.msra.mxu0 %v60_v7  ;;  %158 = vmatpush.msra.mxu1 %v60_v7 }
  0x1d   :  { %162 = vmatpush.msra.mxu2 %v59_v8  ;;  %163 = vmatpush.msra.mxu3 %v59_v8 }
  0x1e   :  { %76 = vmatpush.msra.mxu0 %v59_v8  ;;  %161 = vmatpush.msra.mxu1 %v59_v8 }
  0x1f   :  { %165 = vmatpush.msra.mxu2 %v58_v9  ;;  %166 = vmatpush.msra.mxu3 %v58_v9 }
  0x20   :  { %77 = vmatpush.msra.mxu0 %v58_v9  ;;  %164 = vmatpush.msra.mxu1 %v58_v9 }
  0x21   :  { %168 = vmatpush.msra.mxu2 %v57_v10  ;;  %169 = vmatpush.msra.mxu3 %v57_v10 }
  0x22   :  { %78 = vmatpush.msra.mxu0 %v57_v10  ;;  %167 = vmatpush.msra.mxu1 %v57_v10 }
  0x23   :  { %171 = vmatpush.msra.mxu2 %v56_v11  ;;  %172 = vmatpush.msra.mxu3 %v56_v11 }
  0x24   :  { %79 = vmatpush.msra.mxu0 %v56_v11  ;;  %170 = vmatpush.msra.mxu1 %v56_v11 }
  0x25   :  { %174 = vmatpush.msra.mxu2 %v55_v12  ;;  %175 = vmatpush.msra.mxu3 %v55_v12 }
  0x26   :  { %80 = vmatpush.msra.mxu0 %v55_v12  ;;  %173 = vmatpush.msra.mxu1 %v55_v12 }
  0x27   :  { %177 = vmatpush.msra.mxu2 %v54_v13  ;;  %178 = vmatpush.msra.mxu3 %v54_v13 }
  0x28   :  { %81 = vmatpush.msra.mxu0 %v54_v13  ;;  %176 = vmatpush.msra.mxu1 %v54_v13 }
  0x29   :  { %180 = vmatpush.msra.mxu2 %v53_v14  ;;  %181 = vmatpush.msra.mxu3 %v53_v14 }
  0x2a   :  { %82 = vmatpush.msra.mxu0 %v53_v14  ;;  %179 = vmatpush.msra.mxu1 %v53_v14 }
  0x2b   :  { %183 = vmatpush.msra.mxu2 %v52_v15  ;;  %184 = vmatpush.msra.mxu3 %v52_v15 }
  0x2c   :  { %96 = vmatmul.f32.vlgmr.msra.gmra.mxu2 %v48_v16  ;;  %102 = vmatmul.f32.vlgmr.msra.gmra.mxu3 %v50_v17 }
  0x2d   :  { %83 = vmatpush.msra.mxu0 %v52_v15  ;;  %182 = vmatpush.msra.mxu1 %v52_v15 }
  0x2e   :  { %84 = vmatmul.f32.vlgmr.msra.gmra.mxu0 %v44_v18  ;;  %90 = vmatmul.f32.vlgmr.msra.gmra.mxu1 %v46_v19 }
  0x34   :  { %99 = vmatmul.f32.gmra.mxu2 %v49_v20  ;;  %105 = vmatmul.f32.gmra.mxu3 %v51_v21 }
  0x36   :  { %87 = vmatmul.f32.gmra.mxu0 %v45_v22  ;;  %93 = vmatmul.f32.gmra.mxu1 %v47_v23 }
  0xab   :  { %v85_v24 = vpop.f32.mrf.mxu0  ;;  %v91_v25 = vpop.f32.mrf.mxu1 }
  0xac   :  { %109 = vst [vmem:[#allocation7] sm:$0xff] %v85_v24 }
  0xad   :  { %111 = vst [vmem:[#allocation7 + $0x10] sm:$0xff] %v91_v25 }
  0xaf   :  { %v97_v26 = vpop.f32.mrf.mxu2  ;;  %v103_v27 = vpop.f32.mrf.mxu3 }
  0xb0   :  { %113 = vst [vmem:[#allocation7 + $0x20] sm:$0xff] %v97_v26 }
  0xb1   :  { %115 = vst [vmem:[#allocation7 + $0x30] sm:$0xff] %v103_v27 }
  0xb3   :  { %v88_v28 = vpop.f32.mrf.mxu0  ;;  %v94_v29 = vpop.f32.mrf.mxu1 }
  0xb4   :  { %110 = vst [vmem:[#allocation7 + $0x8] sm:$0xff] %v88_v28 }
  0xb5   :  { %112 = vst [vmem:[#allocation7 + $0x18] sm:$0xff] %v94_v29 }
  0xb7   :  { %v100_v30 = vpop.f32.mrf.mxu2  ;;  %v106_v31 = vpop.f32.mrf.mxu3 }
  0xb8   :  { %114 = vst [vmem:[#allocation7 + $0x28] sm:$0xff] %v100_v30 }
  0xb9   :  { %116 = vst [vmem:[#allocation7 + $0x38] sm:$0xff] %v106_v31 }
  0xba   :  { %129 = dma.vmem_to_hbm [thread:$0]  %s122_s1, 1024, %s124_s23, [#allocation4], %s269_s17, %s269_s17, %s270_s18  }
  0xbb   :  { %266 = dma.done.wait [#allocation4], 1024  }
  0xbc   :  { %267 = vsyncadd [#allocation4], 4294966272 }
  0xbd   :  { %134 = vsyncpa [#allocation3], 1 }
  0xbe   :  { %135 = vsyncpa [#allocation6], 1 }
  0xbf   :  { %136 = vsyncpa [#allocation4], 1 }

</bundles_post_ra>
